<compile_context>
chip_gen: v6e
topology: v6e:2x2x1
jax: 0.10.0
libtpu: 0.0.40
codegen_flags: <defaults>
</compile_context>

<pallas_src>
import functools

import jax
import jax.numpy as jnp
from jax.experimental import pallas as pl
from jax.experimental.pallas import tpu as pltpu


def _round_up(x, mult):
    return (x + mult - 1) // mult * mult


def _vmem_capacity_bytes():
    """Physical per-core VMEM; conservative (v7x-sized) fallback on failure."""
    try:
        cap = getattr(pltpu.get_tpu_info(), "vmem_capacity_bytes", None)
        if cap:
            return int(cap)
    except Exception:
        pass
    return 64 * 1024 * 1024


def _vmem_estimate(block_b, seq, d, d_pad, heads, dim_head):
    """Rough per-grid-step VMEM footprint (bytes) for attention_kernel."""
    m = block_b * seq
    inner = heads * dim_head
    g = heads * block_b
    est = 2 * m * d * 4                                      # x tile (f32, 2x buf)
    est += 2 * m * d_pad * 4                                  # out tile (f32, 2x buf)
    est += (3 * d * inner + inner * d_pad) * 2 + d_pad * 4    # resident weights+bias
    est += 3 * m * inner * (4 + 2)                            # q/k/v f32 + bf16 copies
    est += 3 * g * seq * seq * 4 + g * seq * seq * 2          # scores / exp / probs
    est += g * seq * dim_head * 4                             # PV output (f32)
    est += m * d_pad * 4                                      # projection accumulator
    return est


def _choose_block_b(batch, seq, d, d_pad, heads, dim_head, vmem_budget):
    divisors = [b for b in range(1, batch + 1) if batch % b == 0]
    # Sublane rule: with >1 grid step the token-row block must be a multiple
    # of 8; a single full-array block is exempt.
    shape_ok = [b for b in divisors if (b * seq) % 8 == 0 or b == batch]
    if not shape_ok:
        shape_ok = [batch]
    fitting = [b for b in shape_ok
               if _vmem_estimate(b, seq, d, d_pad, heads, dim_head) <= vmem_budget]
    cands = fitting if fitting else [min(shape_ok)]
    # v7x has 2 TensorCores: keep >= 2 "parallel" grid steps when possible.
    multi = [b for b in cands if batch // b >= 2]
    if multi:
        cands = multi
    # Target ~512 token rows per step (tile sweeps: ~85% of HBM roofline),
    # amortizing ~0.35us/step grid overhead without blowing VMEM.
    target_rows = 512
    under = [b for b in cands if b * seq <= target_rows]
    return max(under) if under else min(cands)


def attention_kernel(x_ref, wq_ref, wk_ref, wv_ref, wo_ref, bo_ref, o_ref,
                     *, block_b, seq, heads, dim_head):
    """One grid step: `block_b` batch elements as a token-major (M, D) slab."""
    m = block_b * seq
    d_pad = o_ref.shape[-1]

    # In-kernel cast (the VPU cast hides under the QKV matmuls).
    xf = x_ref[...].astype(jnp.bfloat16)                      # (M, D)

    # --- QKV projection: lane-dense (M, D) @ (D, inner), f32 accumulation ---
    # (weights pre-split on the host; softmax scale already folded into wq)
    q = jnp.dot(xf, wq_ref[...], preferred_element_type=jnp.float32)
    k = jnp.dot(xf, wk_ref[...], preferred_element_type=jnp.float32)
    v = jnp.dot(xf, wv_ref[...], preferred_element_type=jnp.float32)

    # --- head-major relayout, done in bf16 (half the bytes moved) -----------
    # (M, heads*dh) -> (heads, M, dh) -> (heads*block_b, seq, dh); the final
    # regroup only touches leading dims and is free.
    def to_heads(t):
        t = t.astype(jnp.bfloat16).reshape(m, heads, dim_head)
        t = pltpu.einshape("mhd->hmd", t)                     # (heads, M, dh)
        return t.reshape(heads * block_b, seq, dim_head)

    qh, kh, vh = to_heads(q), to_heads(k), to_heads(v)

    # --- attention, batched over (head, batch-tile) in one einsum stream ----
    s = jnp.einsum('bqd,bkd->bqk', qh, kh,
                   preferred_element_type=jnp.float32)        # (H*Bb, n, n)
    s = s - jnp.max(s, axis=-1, keepdims=True)
    e = jnp.exp(s)
    denom = jnp.sum(e, axis=-1, keepdims=True)
    p = e * pl.reciprocal(denom, approx=True)                 # EUP reciprocal
    o = jnp.einsum('bqk,bkd->bqd', p.astype(jnp.bfloat16), vh,
                   preferred_element_type=jnp.float32)        # (H*Bb, n, dh)

    # --- output projection without a head-merge relayout --------------------
    # Regroup leading dims (free) and accumulate per-head MXU matmuls against
    # the host-pre-split (heads, dh, D_pad) output weight.
    ob = o.astype(jnp.bfloat16).reshape(heads, m, dim_head)
    y = jnp.zeros((m, d_pad), jnp.float32)
    for h in range(heads):
        y = y + jnp.dot(ob[h], wo_ref[h], preferred_element_type=jnp.float32)
    y = y + bo_ref[...]                                       # (1, D_pad) bias
    o_ref[...] = y.astype(o_ref.dtype)


def attention(x, wqkv, wout, bout, *, heads, dim_head, scale, block_b=None):
    B, N, D = x.shape
    inner = heads * dim_head
    assert wqkv.shape == (D, 3 * inner)
    assert wout.shape == (inner, D)
    assert bout.shape == (D,)

    # Lane-dense output: pad the output feature dim to a multiple of 128 so
    # stores are full `vst`s; padding is sliced off on the host.
    D_pad = _round_up(D, 128)

    # Host-side (one-time) weight prep: split fused qkv weight, fold the
    # softmax scale into the q columns, reshape the output weight head-major,
    # cast MXU operands to bf16 (f32 accumulation happens in-kernel).
    wq = (wqkv[:, 0 * inner:1 * inner] * scale).astype(jnp.bfloat16)
    wk = wqkv[:, 1 * inner:2 * inner].astype(jnp.bfloat16)
    wv = wqkv[:, 2 * inner:3 * inner].astype(jnp.bfloat16)
    wo = wout
    bo = bout
    if D_pad != D:
        wo = jnp.pad(wo, ((0, 0), (0, D_pad - D)))
        bo = jnp.pad(bo, (0, D_pad - D))
    wo = wo.astype(jnp.bfloat16).reshape(heads, dim_head, D_pad)
    bo = bo.astype(jnp.float32).reshape(1, D_pad)

    vmem_cap = _vmem_capacity_bytes()
    if block_b is None:
        block_b = _choose_block_b(B, N, D, D_pad, heads, dim_head,
                                  int(vmem_cap * 0.55))
    assert B % block_b == 0
    m = block_b * N
    est = _vmem_estimate(block_b, N, D, D_pad, heads, dim_head)
    vmem_limit = min(int(vmem_cap * 0.9),
                     max(int(est * 1.3), 32 * 1024 * 1024))

    # Token-major 2-D slab; f32 in, cast to bf16 inside the kernel.
    x2 = x.reshape(B * N, D)

    kernel = functools.partial(attention_kernel, block_b=block_b, seq=N,
                               heads=heads, dim_head=dim_head)

    # Weights / bias never change across grid steps: keep a single resident
    # copy in VMEM (no per-step double-buffering).
    resident = pl.BlockSpec(memory_space=pltpu.MemorySpace.VMEM)

    y2 = pl.pallas_call(
        kernel,
        out_shape=jax.ShapeDtypeStruct((B * N, D_pad), x.dtype),
        grid=(B // block_b,),
        in_specs=[
            pl.BlockSpec((m, D), lambda i: (i, 0)),           # x token tile
            resident,                                         # wq (scale folded)
            resident,                                         # wk
            resident,                                         # wv
            resident,                                         # wo (heads, dh, D_pad)
            resident,                                         # bias (1, D_pad)
        ],
        out_specs=pl.BlockSpec((m, D_pad), lambda i: (i, 0)),
        compiler_params=pltpu.CompilerParams(
            dimension_semantics=("parallel",),
            vmem_limit_bytes=vmem_limit),
    )(x2, wq, wk, wv, wo, bo)

    if D_pad != D:
        y2 = y2[:, :D]
    return y2.reshape(B, N, D)


def attention_reference(x, wqkv, wout, bout, *, heads, dim_head, scale):
    """Pure-JAX f32 reference mirroring the PyTorch forward (mask=None)."""
    B, N, D = x.shape
    inner = heads * dim_head
    qkv = x @ wqkv
    q, k, v = jnp.split(qkv, 3, axis=-1)

    def to_heads(t):
        return t.reshape(B, N, heads, dim_head).transpose(0, 2, 1, 3)

    q, k, v = map(to_heads, (q, k, v))
    dots = jnp.einsum('bhid,bhjd->bhij', q, k) * scale
    attn = jax.nn.softmax(dots, axis=-1)
    out = jnp.einsum('bhij,bhjd->bhid', attn, v)
    out = out.transpose(0, 2, 1, 3).reshape(B, N, inner)
    return out @ wout + bout


if __name__ == "__main__":
    # Small shapes consistent with the module: batch=2, seq=8, dim=32,
    # heads=4, dim_head=16 -> inner_dim=64.
    B, N, DIM = 2, 8, 32
    HEADS, DIM_HEAD = 4, 16
    INNER = HEADS * DIM_HEAD
    SCALE = DIM ** (-0.5)            # module uses dim**-0.5, not dim_head**-0.5

    key = jax.random.PRNGKey(0)
    kx, kqkv, kw, kb = jax.random.split(key, 4)

    x = jax.random.normal(kx, (B, N, DIM), dtype=jnp.float32)

    # Deterministic synthetic params (PyTorch-Linear-like uniform init),
    # stored in (in, out) layout so the kernel does x @ W directly.
    bound_qkv = 1.0 / (DIM ** 0.5)
    wqkv = jax.random.uniform(kqkv, (DIM, 3 * INNER), jnp.float32,
                              minval=-bound_qkv, maxval=bound_qkv)
    bound_out = 1.0 / (INNER ** 0.5)
    wout = jax.random.uniform(kw, (INNER, DIM), jnp.float32,
                              minval=-bound_out, maxval=bound_out)
    bout = jax.random.uniform(kb, (DIM,), jnp.float32,
                              minval=-bound_out, maxval=bound_out)

    y = attention(x, wqkv, wout, bout,
                  heads=HEADS, dim_head=DIM_HEAD, scale=SCALE)
    y = jax.block_until_ready(y)

    y_ref = attention_reference(x, wqkv, wout, bout,
                                heads=HEADS, dim_head=DIM_HEAD, scale=SCALE)
    assert y.shape == (B, N, DIM)
    # bf16 MXU inputs + approx reciprocal -> looser tolerance vs f32 reference.
    assert jnp.allclose(y, y_ref, rtol=5e-2, atol=5e-2), "mismatch vs reference"

    print("KERNEL_OK")
</pallas_src>

<mosaic_0001>
module attributes {stable_mosaic.version = 11 : i64} {
  func.func @attention_kernel(%arg0: i32, %arg1: memref<8x32xf32, #tpu.memory_space<vmem>>, %arg2: memref<32x64xbf16, #tpu.memory_space<vmem>>, %arg3: memref<32x64xbf16, #tpu.memory_space<vmem>>, %arg4: memref<32x64xbf16, #tpu.memory_space<vmem>>, %arg5: memref<4x16x128xbf16, #tpu.memory_space<vmem>>, %arg6: memref<1x128xf32, #tpu.memory_space<vmem>>, %arg7: memref<8x128xf32, #tpu.memory_space<vmem>>) attributes {dimension_semantics = [#tpu.dimension_semantics<parallel>], iteration_bounds = array<i64: 2>, scalar_prefetch = 0 : i64, scratch_operands = 0 : i64, tpu.core_type = #tpu.core_type<tc>, window_params = [{transform_indices = @transform_0, window_bounds = array<i64: 8, 32>}, {pipeline_mode = #tpu.pipeline_mode<synchronous>, transform_indices = @transform_1, window_bounds = array<i64: 32, 64>}, {pipeline_mode = #tpu.pipeline_mode<synchronous>, transform_indices = @transform_2, window_bounds = array<i64: 32, 64>}, {pipeline_mode = #tpu.pipeline_mode<synchronous>, transform_indices = @transform_3, window_bounds = array<i64: 32, 64>}, {pipeline_mode = #tpu.pipeline_mode<synchronous>, transform_indices = @transform_4, window_bounds = array<i64: 4, 16, 128>}, {pipeline_mode = #tpu.pipeline_mode<synchronous>, transform_indices = @transform_5, window_bounds = array<i64: 1, 128>}, {transform_indices = @transform_6, window_bounds = array<i64: 8, 128>}]} {
    %c0 = arith.constant 0 : index
    %c0_0 = arith.constant 0 : index
    %0 = vector.load %arg1[%c0, %c0_0] : memref<8x32xf32, #tpu.memory_space<vmem>>, vector<8x32xf32>
    %1 = arith.truncf %0 : vector<8x32xf32> to vector<8x32xbf16>
    %c0_1 = arith.constant 0 : index
    %c0_2 = arith.constant 0 : index
    %2 = vector.load %arg2[%c0_1, %c0_2] : memref<32x64xbf16, #tpu.memory_space<vmem>>, vector<32x64xbf16>
    %cst = arith.constant dense<0.000000e+00> : vector<8x64xf32>
    %3 = tpu.matmul %1, %2, %cst {dimension_numbers = #tpu.dot_dimension_numbers<[1], [0], [0], [1], [0, 0, 1, 1], [], []>} : vector<8x32xbf16>, vector<32x64xbf16>, vector<8x64xf32> -> vector<8x64xf32>
    %c0_3 = arith.constant 0 : index
    %c0_4 = arith.constant 0 : index
    %4 = vector.load %arg3[%c0_3, %c0_4] : memref<32x64xbf16, #tpu.memory_space<vmem>>, vector<32x64xbf16>
    %cst_5 = arith.constant dense<0.000000e+00> : vector<8x64xf32>
    %5 = tpu.matmul %1, %4, %cst_5 {dimension_numbers = #tpu.dot_dimension_numbers<[1], [0], [0], [1], [0, 0, 1, 1], [], []>} : vector<8x32xbf16>, vector<32x64xbf16>, vector<8x64xf32> -> vector<8x64xf32>
    %c0_6 = arith.constant 0 : index
    %c0_7 = arith.constant 0 : index
    %6 = vector.load %arg4[%c0_6, %c0_7] : memref<32x64xbf16, #tpu.memory_space<vmem>>, vector<32x64xbf16>
    %cst_8 = arith.constant dense<0.000000e+00> : vector<8x64xf32>
    %7 = tpu.matmul %1, %6, %cst_8 {dimension_numbers = #tpu.dot_dimension_numbers<[1], [0], [0], [1], [0, 0, 1, 1], [], []>} : vector<8x32xbf16>, vector<32x64xbf16>, vector<8x64xf32> -> vector<8x64xf32>
    %8 = arith.truncf %3 : vector<8x64xf32> to vector<8x64xbf16>
    %9 = vector.shape_cast %8 : vector<8x64xbf16> to vector<8x4x16xbf16>
    %10 = tpu.transpose %9, [1, 0, 2] : vector<8x4x16xbf16> -> vector<4x8x16xbf16>
    %11 = arith.truncf %5 : vector<8x64xf32> to vector<8x64xbf16>
    %12 = vector.shape_cast %11 : vector<8x64xbf16> to vector<8x4x16xbf16>
    %13 = tpu.transpose %12, [1, 0, 2] : vector<8x4x16xbf16> -> vector<4x8x16xbf16>
    %14 = arith.truncf %7 : vector<8x64xf32> to vector<8x64xbf16>
    %15 = vector.shape_cast %14 : vector<8x64xbf16> to vector<8x4x16xbf16>
    %16 = tpu.transpose %15, [1, 0, 2] : vector<8x4x16xbf16> -> vector<4x8x16xbf16>
    "tpu.trace_start"() <{level = 10 : i32, message = "bqd,bkd->bqk"}> : () -> ()
    %cst_9 = arith.constant dense<0.000000e+00> : vector<4x8x8xf32>
    %17 = tpu.matmul %10, %13, %cst_9 {dimension_numbers = #tpu.dot_dimension_numbers<[2], [2], [1], [1], [0, 0, 0, 1, 1, 1], [0], [0]>} : vector<4x8x16xbf16>, vector<4x8x16xbf16>, vector<4x8x8xf32> -> vector<4x8x8xf32>
    "tpu.trace_stop"() : () -> ()
    %cst_10 = arith.constant dense<0xFF800000> : vector<4x8xf32>
    %18 = vector.multi_reduction <maximumf>, %17, %cst_10 [2] : vector<4x8x8xf32> to vector<4x8xf32>
    %19 = vector.shape_cast %18 : vector<4x8xf32> to vector<4x8x1xf32>
    %20 = vector.broadcast %19 : vector<4x8x1xf32> to vector<4x8x8xf32>
    %21 = arith.subf %17, %20 : vector<4x8x8xf32>
    %22 = math.exp %21 : vector<4x8x8xf32>
    %cst_11 = arith.constant dense<0.000000e+00> : vector<4x8xf32>
    %23 = vector.multi_reduction <add>, %22, %cst_11 [2] : vector<4x8x8xf32> to vector<4x8xf32>
    %24 = vector.shape_cast %23 : vector<4x8xf32> to vector<4x8x1xf32>
    %25 = tpu.reciprocal %24 {approx = true} : vector<4x8x1xf32> -> vector<4x8x1xf32>
    %26 = vector.broadcast %25 : vector<4x8x1xf32> to vector<4x8x8xf32>
    %27 = arith.mulf %22, %26 : vector<4x8x8xf32>
    %28 = arith.truncf %27 : vector<4x8x8xf32> to vector<4x8x8xbf16>
    "tpu.trace_start"() <{level = 10 : i32, message = "bqk,bkd->bqd"}> : () -> ()
    %cst_12 = arith.constant dense<0.000000e+00> : vector<4x8x16xf32>
    %29 = tpu.matmul %28, %16, %cst_12 {dimension_numbers = #tpu.dot_dimension_numbers<[2], [1], [1], [2], [0, 0, 0, 1, 1, 2], [0], [0]>} : vector<4x8x8xbf16>, vector<4x8x16xbf16>, vector<4x8x16xf32> -> vector<4x8x16xf32>
    "tpu.trace_stop"() : () -> ()
    %30 = arith.truncf %29 : vector<4x8x16xf32> to vector<4x8x16xbf16>
    %cst_13 = arith.constant 0.000000e+00 : f32
    %31 = vector.broadcast %cst_13 : f32 to vector<8x128xf32>
    %32 = vector.extract_strided_slice %30 {offsets = [0, 0, 0], sizes = [1, 8, 16], strides = [1, 1, 1]} : vector<4x8x16xbf16> to vector<1x8x16xbf16>
    %33 = vector.shape_cast %32 : vector<1x8x16xbf16> to vector<8x16xbf16>
    %c0_14 = arith.constant 0 : index
    %c0_15 = arith.constant 0 : index
    %c0_16 = arith.constant 0 : index
    %34 = vector.load %arg5[%c0_14, %c0_15, %c0_16] : memref<4x16x128xbf16, #tpu.memory_space<vmem>>, vector<1x16x128xbf16>
    %35 = vector.shape_cast %34 : vector<1x16x128xbf16> to vector<16x128xbf16>
    %cst_17 = arith.constant dense<0.000000e+00> : vector<8x128xf32>
    %36 = tpu.matmul %33, %35, %cst_17 {dimension_numbers = #tpu.dot_dimension_numbers<[1], [0], [0], [1], [0, 0, 1, 1], [], []>} : vector<8x16xbf16>, vector<16x128xbf16>, vector<8x128xf32> -> vector<8x128xf32>
    %37 = arith.addf %31, %36 : vector<8x128xf32>
    %38 = vector.extract_strided_slice %30 {offsets = [1, 0, 0], sizes = [1, 8, 16], strides = [1, 1, 1]} : vector<4x8x16xbf16> to vector<1x8x16xbf16>
    %39 = vector.shape_cast %38 : vector<1x8x16xbf16> to vector<8x16xbf16>
    %c1 = arith.constant 1 : index
    %c0_18 = arith.constant 0 : index
    %c0_19 = arith.constant 0 : index
    %40 = vector.load %arg5[%c1, %c0_18, %c0_19] : memref<4x16x128xbf16, #tpu.memory_space<vmem>>, vector<1x16x128xbf16>
    %41 = vector.shape_cast %40 : vector<1x16x128xbf16> to vector<16x128xbf16>
    %cst_20 = arith.constant dense<0.000000e+00> : vector<8x128xf32>
    %42 = tpu.matmul %39, %41, %cst_20 {dimension_numbers = #tpu.dot_dimension_numbers<[1], [0], [0], [1], [0, 0, 1, 1], [], []>} : vector<8x16xbf16>, vector<16x128xbf16>, vector<8x128xf32> -> vector<8x128xf32>
    %43 = arith.addf %37, %42 : vector<8x128xf32>
    %44 = vector.extract_strided_slice %30 {offsets = [2, 0, 0], sizes = [1, 8, 16], strides = [1, 1, 1]} : vector<4x8x16xbf16> to vector<1x8x16xbf16>
    %45 = vector.shape_cast %44 : vector<1x8x16xbf16> to vector<8x16xbf16>
    %c2 = arith.constant 2 : index
    %c0_21 = arith.constant 0 : index
    %c0_22 = arith.constant 0 : index
    %46 = vector.load %arg5[%c2, %c0_21, %c0_22] : memref<4x16x128xbf16, #tpu.memory_space<vmem>>, vector<1x16x128xbf16>
    %47 = vector.shape_cast %46 : vector<1x16x128xbf16> to vector<16x128xbf16>
    %cst_23 = arith.constant dense<0.000000e+00> : vector<8x128xf32>
    %48 = tpu.matmul %45, %47, %cst_23 {dimension_numbers = #tpu.dot_dimension_numbers<[1], [0], [0], [1], [0, 0, 1, 1], [], []>} : vector<8x16xbf16>, vector<16x128xbf16>, vector<8x128xf32> -> vector<8x128xf32>
    %49 = arith.addf %43, %48 : vector<8x128xf32>
    %50 = vector.extract_strided_slice %30 {offsets = [3, 0, 0], sizes = [1, 8, 16], strides = [1, 1, 1]} : vector<4x8x16xbf16> to vector<1x8x16xbf16>
    %51 = vector.shape_cast %50 : vector<1x8x16xbf16> to vector<8x16xbf16>
    %c3 = arith.constant 3 : index
    %c0_24 = arith.constant 0 : index
    %c0_25 = arith.constant 0 : index
    %52 = vector.load %arg5[%c3, %c0_24, %c0_25] : memref<4x16x128xbf16, #tpu.memory_space<vmem>>, vector<1x16x128xbf16>
    %53 = vector.shape_cast %52 : vector<1x16x128xbf16> to vector<16x128xbf16>
    %cst_26 = arith.constant dense<0.000000e+00> : vector<8x128xf32>
    %54 = tpu.matmul %51, %53, %cst_26 {dimension_numbers = #tpu.dot_dimension_numbers<[1], [0], [0], [1], [0, 0, 1, 1], [], []>} : vector<8x16xbf16>, vector<16x128xbf16>, vector<8x128xf32> -> vector<8x128xf32>
    %55 = arith.addf %49, %54 : vector<8x128xf32>
    %c0_27 = arith.constant 0 : index
    %c0_28 = arith.constant 0 : index
    %56 = vector.load %arg6[%c0_27, %c0_28] : memref<1x128xf32, #tpu.memory_space<vmem>>, vector<1x128xf32>
    %57 = vector.broadcast %56 : vector<1x128xf32> to vector<8x128xf32>
    %58 = arith.addf %55, %57 : vector<8x128xf32>
    %c0_29 = arith.constant 0 : index
    %c0_30 = arith.constant 0 : index
    %59 = vector.load %arg7[%c0_29, %c0_30] : memref<8x128xf32, #tpu.memory_space<vmem>>, vector<8x128xf32>
    tpu.vector_store %arg7[%c0_29, %c0_30], %58 {strides = array<i32>} : memref<8x128xf32, #tpu.memory_space<vmem>>, vector<8x128xf32>,
    return
  }
  func.func @transform_0(%arg0: i32) -> (i32, i32) {
    %c0_i32 = arith.constant 0 : i32
    %c0_i32_0 = arith.constant 0 : i32
    return %arg0, %c0_i32 : i32, i32
  }
  func.func @transform_1(%arg0: i32) -> (i32, i32) {
    %c0_i32 = arith.constant 0 : i32
    %c0_i32_0 = arith.constant 0 : i32
    %c0_i32_1 = arith.constant 0 : i32
    return %c0_i32, %c0_i32_0 : i32, i32
  }
  func.func @transform_2(%arg0: i32) -> (i32, i32) {
    %c0_i32 = arith.constant 0 : i32
    %c0_i32_0 = arith.constant 0 : i32
    %c0_i32_1 = arith.constant 0 : i32
    return %c0_i32, %c0_i32_0 : i32, i32
  }
  func.func @transform_3(%arg0: i32) -> (i32, i32) {
    %c0_i32 = arith.constant 0 : i32
    %c0_i32_0 = arith.constant 0 : i32
    %c0_i32_1 = arith.constant 0 : i32
    return %c0_i32, %c0_i32_0 : i32, i32
  }
  func.func @transform_4(%arg0: i32) -> (i32, i32, i32) {
    %c0_i32 = arith.constant 0 : i32
    %c0_i32_0 = arith.constant 0 : i32
    %c0_i32_1 = arith.constant 0 : i32
    %c0_i32_2 = arith.constant 0 : i32
    return %c0_i32, %c0_i32_0, %c0_i32_1 : i32, i32, i32
  }
  func.func @transform_5(%arg0: i32) -> (i32, i32) {
    %c0_i32 = arith.constant 0 : i32
    %c0_i32_0 = arith.constant 0 : i32
    %c0_i32_1 = arith.constant 0 : i32
    return %c0_i32, %c0_i32_0 : i32, i32
  }
  func.func @transform_6(%arg0: i32) -> (i32, i32) {
    %c0_i32 = arith.constant 0 : i32
    %c0_i32_0 = arith.constant 0 : i32
    return %arg0, %c0_i32 : i32, i32
  }
}

</mosaic_0001>

<bundles_post_ra>
// kernel: tpu_custom_call.1
= control target key start
LH: loop header
LB: loop body
LE: loop exit
PB: predicated region body
PF: predicated region fallthrough
CT: control target
= control target key end

     0   :  { %s2727_s0 = inlined_call_operand.hbm [shape: f32[16,32], index: 0, kind: input, shape index: {}]   ;;  %s2728_s1 = inlined_call_operand.hbm [shape: bf16[32,64], index: 1, kind: input, shape index: {}]   ;;  %s2729_s2 = inlined_call_operand.hbm [shape: bf16[32,64], index: 2, kind: input, shape index: {}]   ;;  %s2730_s3 = inlined_call_operand.hbm [shape: bf16[32,64], index: 3, kind: input, shape index: {}]   ;;  %s2731_s4 = inlined_call_operand.hbm [shape: bf16[4,16,128], index: 4, kind: input, shape index: {}]   ;;  %s2732_s5 = inlined_call_operand.vmem [shape: f32[1,128], index: 5, kind: input, shape index: {}]   ;;  %s2733_s6 = inlined_call_operand.hbm [shape: f32[16,128], index: 6, kind: output, shape index: {}]  }
   0x1   :  { %2738 = sst [smem:[#allocation16_spill]] %s2728_s1 }
   0x2   :  { %11 = vsyncpa [#allocation3], 0 }
   0x3   :  { %13 = vsyncpa [#allocation3 + $0x1], 0 }
   0x4   :  { %14 = vsyncpa [#allocation6], 0 }
   0x5   :  { %15 = vsyncpa [#allocation9], 0 }
   0x6   :  { %16 = vsyncpa [#allocation4], 0 }
   0x7   :  { %18 = vsyncpa [#allocation4 + $0x1], 0  ;;  %s2325_s21 = smov 0   ;;  %s2327_s22 = smov 0  }
   0x8   :  { %s2329_s23 = smov 0   ;;  %s2331_s24 = smov 0  }
   0x9 LB: > { %s2274_s25 = smov [#allocation5]   ;;  %s2346_s27 = sadd.s32 4294967295, %s2272_s24   ;;  %s2272_s24 = sphi %s2331_s24, %s2759_s24   ;;  %s2268_s23 = sphi %s2329_s23, %s2758_s23   ;;  %s2264_s22 = sphi %s2327_s22, %s2757_s22   ;;  %s2260_s21 = sphi %s2325_s21, %s2756_s21  }
   0xa   : > { %s198_s26 = sshll.u32 %s2274_s25, 4  ;;  %p1771_p0 = scmp.ge.s32.totalorder %s2272_s24, 1  ;;  %s199_s26 = int_to_ptr.vmem [resolvable:$true] %s198_s26 }
   0xb   : > { %p2734_p1 = scmp.eq.s32.totalorder %s2346_s27, 0  ;;  %p186_p2 = scmp.lt.s32.totalorder %s2272_s24, 3 }
   0xc   : > { %s2275_s29 = smov [#allocation8]   ;;  %s2276_s8 = smov [#allocation7]  }
   0xd   : > { %p2351_p3 = pnand %p1771_p0, %p186_p2  ;;  %s224_s30 = sshll.u32 %s2275_s29, 4  ;;  %s2364_s30 = int_to_ptr.vmem [resolvable:$true] %s224_s30 }
   0xe   : > { %s211_s9 = sshll.u32 %s2276_s8, 4  ;;  %s2079_s10 = scalar_lea.vmem %s199_s26, 256  ;;  %s2366_s9 = int_to_ptr.vmem [resolvable:$true] %s211_s9 }
   0xf   : > { %s2739_s28 = scalar_select %p2351_p3, 1, 0 }
  0x10   : > { %p1965_p5 = pneg %p2351_p3  ;;  %p2080_p8 = scmp.ne.s32.totalorder %s199_s26, %s2079_s10 }
  0x11   : > { %p2087_p11 = scmp.lt.s32.totalorder %s199_s26, %s199_s26  ;;  %p2088_p12 = scmp.lt.s32.totalorder %s2079_s10, %s2079_s10 }
  0x12   : > { %p2360_p6 = pnand %p1965_p5, %p2734_p1 }
  0x13   : > { %p2089_p13 = por %p2088_p12, %p2087_p11 }
  0x14   : > { %p2070_p7 = pneg %p2360_p6 }
  0x16   : > { %p2082_p9 = pnand %p2080_p8, %p2070_p7 }
  0x18   : > { %p2083_p10 = pneg %p2082_p9 }
  0x1a   : > { %p2090_p0 = pnand %p2089_p13, %p2083_p10 }
  0x1c   : > { %2093 = shalt.err (!%p2090_p0)
}
  0x1d   : > { %s2277_s11 = smov 64   ;;  %s2278_s12 = smov 4  }
  0x1e   : > { %s2741_s1 = sld [smem:[#allocation16_spill]]  ;;  %s2105_s15 = scalar_lea.vmem %s2364_s30, 256 }
  0x1f   : > { %p2106_p2 = scmp.ne.s32.totalorder %s2364_s30, %s2105_s15  ;;  %p2113_p9 = scmp.lt.s32.totalorder %s2364_s30, %s2364_s30 }
  0x20   : > { %p2114_p10 = scmp.lt.s32.totalorder %s2105_s15, %s2105_s15 }
  0x21   : > { %p2108_p5 = pnand %p2106_p2, %p2070_p7 }
  0x22   : > { %p2115_p11 = por %p2114_p10, %p2113_p9 }
  0x23   : > { %p2109_p8 = pneg %p2108_p5 }
  0x24   : > { %1968 = dma.hbm_to_vmem [thread:$0]  (!%p2360_p6), %s2741_s1, 256, %s199_s26, [#allocation6], %s2277_s11, %s2277_s11, %s2278_s12  }
  0x25   : > { %p2116_p12 = pnand %p2115_p11, %p2109_p8 }
  0x27   : > { %2119 = shalt.err (!%p2116_p12)
}
  0x28   : > { %1974 = dma.hbm_to_vmem [thread:$0]  (!%p2360_p6), %s2730_s3, 256, %s2364_s30, [#allocation9], %s2277_s11, %s2277_s11, %s2278_s12  }
  0x29   : > { %s2131_s18 = scalar_lea.vmem %s2366_s9, 256  ;;  %p2139_p5 = scmp.lt.s32.totalorder %s2366_s9, %s2366_s9 }
  0x2a   : > { %p2132_p13 = scmp.ne.s32.totalorder %s2366_s9, %s2131_s18  ;;  %p2140_p8 = scmp.lt.s32.totalorder %s2131_s18, %s2131_s18 }
  0x2c   : > { %p2134_p0 = pnand %p2132_p13, %p2070_p7  ;;  %p2141_p9 = por %p2140_p8, %p2139_p5 }
  0x2e   : > { %p2135_p2 = pneg %p2134_p0 }
  0x30   : > { %p2142_p10 = pnand %p2141_p9, %p2135_p2 }
  0x32   : > { %2145 = shalt.err (!%p2142_p10)
}
  0x33   : > { %1971 = dma.hbm_to_vmem [thread:$0]  (!%p2360_p6), %s2729_s2, 256, %s2366_s9, [#allocation6], %s2277_s11, %s2277_s11, %s2278_s12  }
  0x34   : > { %s2279_s25 = smov [#allocation10]  }
  0x35   : > { %s237_s26 = sshll.u32 %s2279_s25, 4  ;;  %s238_s26 = int_to_ptr.vmem [resolvable:$true] %s237_s26 }
  0x36   : > { %s2157_s29 = scalar_lea.vmem %s238_s26, 512  ;;  %p2165_p0 = scmp.lt.s32.totalorder %s238_s26, %s238_s26 }
  0x37   : > { %p2158_p11 = scmp.ne.s32.totalorder %s238_s26, %s2157_s29  ;;  %p2166_p2 = scmp.lt.s32.totalorder %s2157_s29, %s2157_s29 }
  0x39   : > { %p2160_p12 = pnand %p2158_p11, %p2070_p7  ;;  %p2167_p5 = por %p2166_p2, %p2165_p0 }
  0x3b   : > { %p2161_p13 = pneg %p2160_p12 }
  0x3d   : > { %p2168_p8 = pnand %p2167_p5, %p2161_p13 }
  0x3f   : > { %2171 = shalt.err (!%p2168_p8)
}
  0x40   : > { %1977 = dma.hbm_to_vmem [thread:$0]  (!%p2360_p6), %s2731_s4, 512, %s238_s26, [#allocation9], %s2277_s11, %s2277_s11, %s2278_s12  }
  0x41   : > { %s1770_s7 = sadd.s32 4294967294, %s2272_s24   ;;  %s2426_s9 = sadd.s32 1, %s2272_s24  }
  0x42   : > { %s28_s10 = ssub.s32 %s2272_s24, %s2426_s9  ;;  %s31_s13 = sadd.s32 1, %s2268_s23 }
  0x43   : > { %p29_p7 = scmp.eq.s32.totalorder %s28_s10, 0  ;;  %p38_p9 = scmp.ne.s32.totalorder %s2268_s23, %s2264_s22 }
  0x44   : > { %p39_p10 = scmp.eq.s32.totalorder %s2272_s24, 0  ;;  %p44_p11 = scmp.ne.s32.totalorder %s2264_s22, %s2260_s21 }
  0x45   : > { %s2437_s14 = scalar_select %p29_p7, %s2268_s23, %s31_s13  }
  0x46   : > { %p2439_p12 = por %p39_p10, %p38_p9  ;;  %p2445_p6 = por %p2734_p1, %p44_p11 }
  0x47   : > { %p173_p13 = scmp.eq.s32.totalorder %s2346_s27, 1  ;;  %p179_p0 = scmp.eq.s32.totalorder %s1770_s7, 1 }
  0x48   : > { %s2743_s11 = scalar_select %p2445_p6, 1, 0 }
  0x49   : > { %p1990_p2 = scmp.lt.s32.totalorder %s2272_s24, 2  ;;  %s254_s12 = sand.u32 1, %s2268_s23  }
  0x4a   : > { %p2452_p5 = por %p173_p13, %p38_p9  ;;  %p2456_p8 = por %p179_p0, %p44_p11 }
  0x4b   : > { %s1777_s18 = sshll.u32 %s254_s12, 3  ;;  %s1778_s19 = sshll.u32 %s2272_s24, 7 }
  0x4c   : > { %s2744_s16 = scalar_select %p2452_p5, 1, 0 }
  0x4d   : > { %s2745_s17 = scalar_select %p2456_p8, 1, 0 }
  0x4e   : > { %s2464_s26 = scalar_lea.hbm %s2727_s0, %s1778_s19  ;;  %s258_s29 = scalar_lea.vmem [#allocation2], %s1777_s18 }
  0x4f   : > { %s265_s30 = sshll.u32 %s258_s29, 4  ;;  %p2468_p7 = pnand %p1990_p2, %p2439_p12  ;;  %s266_s30 = int_to_ptr.vmem [resolvable:$true] %s265_s30 }
  0x50   : > { %s255_s7 = scalar_lea.sflag [#allocation3], %s254_s12  ;;  %s2172_s10 = scalar_lea.hbm %s2464_s26, 128 }
  0x51   : > { %p2173_p9 = scmp.ne.s32.totalorder %s2464_s26, %s2172_s10  ;;  %p2174_p10 = pneg %p2468_p7 }
  0x52   : > { %s2177_s20 = scalar_lea.hbm %s2727_s0, 256  ;;  %p2178_p0 = scmp.lt.s32.totalorder %s2464_s26, %s2727_s0 }
  0x53   : > { %p2175_p11 = pnand %p2174_p10, %p2173_p9  ;;  %p2179_p12 = scmp.lt.s32.totalorder %s2177_s20, %s2172_s10 }
  0x55   : > { %p2176_p13 = pneg %p2175_p11  ;;  %p2180_p2 = por %p2179_p12, %p2178_p0 }
  0x57   : > { %p2181_p4 = pnand %p2180_p2, %p2176_p13 }
  0x59   : > { %2184 = shalt.err (!%p2181_p4)
}
  0x5a   : > { %s2185_s15 = scalar_lea.vmem %s266_s30, 128  ;;  %s2280_s12 = smov [#allocation2]  }
  0x5b   : > { %p2186_p1 = scmp.ne.s32.totalorder %s266_s30, %s2185_s15  ;;  %s2190_s29 = sshll.u32 %s2280_s12, 4  ;;  %s2191_s29 = int_to_ptr.vmem [resolvable:$false] %s2190_s29 }
  0x5c   : > { %s2192_s1 = scalar_lea.vmem %s2191_s29, 256  ;;  %p2193_p9 = scmp.lt.s32.totalorder %s266_s30, %s2191_s29 }
  0x5d   : > { %p2188_p8 = pnand %p2186_p1, %p2174_p10  ;;  %p2194_p11 = scmp.lt.s32.totalorder %s2192_s1, %s2185_s15 }
  0x5f   : > { %p2189_p5 = pneg %p2188_p8  ;;  %p2195_p6 = por %p2194_p11, %p2193_p9 }
  0x61   : > { %p2196_p3 = pnand %p2195_p6, %p2189_p5 }
  0x63   : > { %2199 = shalt.err (!%p2196_p3)
}
  0x64   : > { %1981 = dma.hbm_to_vmem [thread:$0]  (!%p2468_p7), %s2464_s26, 128, %s266_s30, %s255_s7  }
  0x65   : > { %p2747_p13 = scmp.ne.s32.totalorder %s2739_s28, 0 }
  0x66   : > { %s2489_s10 = sand.u32 (!%p2747_p13), 1, %s2264_s22   ;;  %p2748_p1 = scmp.ne.s32.totalorder (!%p2747_p13), %s2743_s11, 0 }
  0x67   : > { %274 = sbr.rel (%p2747_p13) target bundleno = 1440 (0x5a0), region = 44  ;;  %s1780_s13 = sshll.u32 (!%p2747_p13), %s2489_s10, 3 }
  0x68   : > { %s277_s19 = scalar_lea.sflag (!%p2747_p13), [#allocation3], %s2489_s10  ;;  %s280_s1 = scalar_lea.vmem (!%p2747_p13), [#allocation2], %s1780_s13 }
  0x6c   : > { %2243 = dma.done.wait (%p2748_p1), %s277_s19, 128  }
  0x6d   : > { %2245 = vsyncadd (%p2748_p1), %s277_s19, 4294967168  ;;  %p2749_p3 = scmp.eq.s32.totalorder %s2346_s27, 0 }
  0x6f   : > { %2247 = dma.done.wait (%p2749_p3), [#allocation6], 512   ;;  %p2750_p4 = pmov %p2749_p3 }
  0x70   : > { %p2751_p6 = pmov %p2749_p3 }
  0x71   : > { %2249 = vsyncadd (%p2750_p4), [#allocation6], 4294966784 }
  0x72   : > { %2251 = dma.done.wait (%p2751_p6), [#allocation9], 768   ;;  %p2752_p5 = pmov %p2749_p3 }
  0x73   : > { %v2281_v0 = vmov 0.0   ;;  %vm2282_vm0 = vmmov 0   ;;  %v2042_v1 = vld [vmem:[#allocation7 + $0x8] sm:$0xff]   ;;  %v2043_v2 = vld [vmem:[#allocation5 + $0x8] sm:$0xff]   ;;  %v2044_v3 = vld [vmem:[#allocation7] sm:$0xff]   ;;  %vm344_vm1 = vcmask 261120   ;;  %v511_v21 = vlaneseq }
  0x74   : > { %2253 = vsyncadd (%p2752_p5), [#allocation9], 4294966528  ;;  %1857 = vmatprep.subr.bf16.mxu1 %v2281_v0  ;;  %1849 = vmatprep.subr.bf16.mxu0 %v2281_v0  ;;  %v2045_v4 = vld [vmem:[#allocation5] sm:$0xff]   ;;  %v326_v5 = vld [vmem:[%s280_s1] sm:$0xff]  ;;  %s2283_s28 = smov 80   ;;  %s2284_s11 = smov 112  }
  0x75   : > { %1861 = vmatprep.mubr.msk.bf16.mxu1 %vm2282_vm0, %v2281_v0  ;;  %1853 = vmatprep.mubr.msk.bf16.mxu0 %vm2282_vm0, %v2281_v0  ;;  %v327_v6 = vpack.c.bf16 %v326_v5, %v326_v5  ;;  %s2285_s26 = smov 96   ;;  %v2046_v17 = vld [vmem:[#allocation8 + $0x8] sm:$0xff]   ;;  %v2047_v18 = vld [vmem:[#allocation8] sm:$0xff]   ;;  %v2286_v19 = vmov 1983009808   ;;  %v512_v25 = vshrl.u32 %v511_v21, 7 }
  0x76   : > { %1858 = vmatpush3.bf16.msra.mxu1 %v2042_v1  ;;  %1850 = vmatpush3.bf16.msra.mxu0 %v2043_v2  ;;  %v509_v20 = vunpack.c.l.s4 %v2286_v19  ;;  %v2287_v22 = vmov 1934713408   ;;  %v2288_v41 = vmov 0   ;;  %vm1007_vm2 = vcmask 130048   ;;  %s1813_s7 = sshll.u32 %s2346_s27, 7  ;;  %s324_s20 = scalar_lea.vmem [#allocation11], %s1780_s13 }
  0x77   : > { %1859 = vmatprep.subr.bf16.mxu1 %v2281_v0  ;;  %1851 = vmatprep.subr.bf16.mxu0 %v2281_v0  ;;  %v526_v23 = vunpack.c.l.s4 %v2287_v22  ;;  %vm1192_vm3 = vcmask 64512   ;;  %vm1244_vm4 = vcmask 1043456   ;;  %s1662_s18 = sshll.u32 %s324_s20, 4  ;;  %s2684_s12 = scalar_lea.hbm %s2733_s6, %s1813_s7  ;;  %s2686_s18 = int_to_ptr.vmem [resolvable:$true] %s1662_s18 }
  0x78   : > { %v510_v24 = vunpack.c.0.s8 %v509_v20  ;;  %s1649_s27 = scalar_lea.sflag [#allocation4], %s2489_s10  ;;  %s2200_s29 = scalar_lea.vmem %s2686_s18, 128 }
  0x79   : > { %v527_v26 = vunpack.c.0.s8 %v526_v23  ;;  %p2201_p8 = scmp.ne.s32.totalorder %s2686_s18, %s2200_s29  ;;  %p2753_p7 = scmp.ne.s32.totalorder %s2744_s16, 0 }
  0x7a   : > { %1860 = vmatpush3.bf16.msra.mxu1 %v2044_v3  ;;  %1852 = vmatpush3.bf16.msra.mxu0 %v2045_v4  ;;  %v2534_v27 = vsub.s32 %v510_v24, %v512_v25  ;;  %s2289_s13 = smov [#allocation11]  }
  0x7b   : > { %1873 = vmatprep.subr.bf16.mxu1 %v2281_v0  ;;  %1865 = vmatprep.subr.bf16.mxu0 %v2281_v0  ;;  %v2537_v31 = vsub.s32 %v527_v26, %v512_v25  ;;  %p2202_p10 = pnand %p2201_p8, %p2753_p7  ;;  %s2204_s19 = sshll.u32 %s2289_s13, 4  ;;  %s2205_s19 = int_to_ptr.vmem [resolvable:$false] %s2204_s19 }
  0x7c   : > { %s2206_s1 = scalar_lea.vmem %s2205_s19, 256  ;;  %p2207_p12 = scmp.lt.s32.totalorder %s2686_s18, %s2205_s19 }
  0x7d   : > { %1862 = vmatmul.mubr.msk.bf16.vlgmr.msra.gmra.mxu1 %vm344_vm1, %v327_v6  ;;  %1854 = vmatmul.mubr.msk.bf16.vlgmr.msra.gmra.mxu0 %vm344_vm1, %v327_v6  ;;  %p2203_p0 = pneg %p2202_p10  ;;  %p2208_p2 = scmp.lt.s32.totalorder %s2206_s1, %s2200_s29 }
  0x7e   : > { %1875 = vmatprep.mubr.msk.bf16.mxu1 %vm2282_vm0, %v2281_v0  ;;  %1869 = vmatprep.mubr.msk.bf16.mxu0 %vm2282_vm0, %v2281_v0 }
  0x7f   : > { %1866 = vmatpush3.bf16.msra.mxu0 %v2046_v17  ;;  %p2209_p9 = por %p2208_p2, %p2207_p12 }
  0x80   : > { %1867 = vmatprep.subr.bf16.mxu0 %v2281_v0 }
  0x81   : > { %p2210_p11 = pnand %p2209_p9, %p2203_p0 }
  0x83   : > { %1868 = vmatpush3.bf16.msra.mxu0 %v2047_v18 }
  0x84   : > { %1879 = vmatprep.subr.bf16.mxu0 %v2281_v0 }
  0x86   : > { %1870 = vmatmul.mubr.msk.bf16.vlgmr.msra.gmra.mxu0 %vm344_vm1, %v327_v6 }
  0x87   : > { %1881 = vmatprep.mubr.msk.bf16.mxu0 %vm2282_vm0, %v2281_v0 }
 0x13d   : > { %v438_v7 = vpop.f32.mrf.mxu1  ;;  %v382_v9 = vpop.f32.mrf.mxu0 }
 0x13e   : > { %v669_v8 = vpack.c.bf16 %v438_v7, %v438_v7  ;;  %v500_v11 = vpack.c.bf16 %v382_v9, %v382_v9 }
 0x13f   : > { %v1863_v10 = vpop.f32.mrf.mxu1  ;;  %v1855_v12 = vpop.f32.mrf.mxu0 }
 0x140   : > { %675 = vrot.lane.b32.xlu1 %v669_v8, %s2283_s28  ;;  %671 = vrot.lane.b32.xlu0 %v669_v8, %s2284_s11  ;;  %v683_v40 = vrot.slane %v669_v8, %v2534_v27  ;;  %v514_v48 = vrot.slane %v500_v11, %v2534_v27 }
 0x141   : > { %v441_v13 = vpop.f32.mrf.mxu1  ;;  %v385_v14 = vpop.f32.mrf.mxu0 }
 0x143   : > { %v1864_v15 = vpop.f32.mrf.mxu1  ;;  %v1856_v16 = vpop.f32.mrf.mxu0 }
 0x144   : > { %673 = vrot.lane.b32.xlu0 %v669_v8, %s2285_s26  ;;  %502 = vrot.lane.b32.xlu1 %v500_v11, %s2284_s11 }
 0x148   : > { %504 = vrot.lane.b32.xlu0 %v500_v11, %s2285_s26  ;;  %506 = vrot.lane.b32.xlu1 %v500_v11, %s2283_s28 }
 0x1b2   : > { %v676_v28 = vpop.permute.xlu1 %675  ;;  %v672_v29 = vpop.permute.xlu0 %671 }
 0x1b3   : > { %v725_v30 = vrot.slane %v676_v28, %v2534_v27  ;;  %v717_v32 = vrot.slane %v672_v29, %v2534_v27 }
 0x1b5   : > { %v726_v33 = vcombine.low %v717_v32, %v725_v30  ;;  %v727_v34 = vcombine.high %v717_v32, %v725_v30 }
 0x1b6   : > { %v674_v35 = vpop.permute.xlu0 %673  ;;  %v503_v36 = vpop.permute.xlu1 %502 }
 0x1b7   : > { %v734_v37 = vrot.slane %v726_v33, %v2537_v31  ;;  %v741_v38 = vrot.slane %v727_v34, %v2537_v31  ;;  %v691_v39 = vrot.slane %v674_v35, %v2534_v27  ;;  %v548_v44 = vrot.slane %v503_v36, %v2534_v27 }
 0x1b9   : > { %v742_v42 = vcombine.high %v734_v37, %v2288_v41  ;;  %v743_v43 = vcombine.high %v741_v38, %v2288_v41  ;;  %v692_v45 = vcombine.low %v683_v40, %v691_v39  ;;  %v693_v46 = vcombine.high %v683_v40, %v691_v39 }
 0x1ba   : > { %v505_v47 = vpop.permute.xlu0 %504  ;;  %v507_v49 = vpop.permute.xlu1 %506  ;;  %v749_v50 = vshrl.u32 %v734_v37, 16  ;;  %v765_v51 = vshrl.u32 %v741_v38, 16 }
 0x1bb   : > { %v522_v52 = vrot.slane %v505_v47, %v2534_v27  ;;  %v556_v53 = vrot.slane %v507_v49, %v2534_v27  ;;  %v757_v54 = vshrl.u32 %v742_v42, 16  ;;  %v773_v55 = vshrl.u32 %v743_v43, 16 }
 0x1bc   : > { %v700_v56 = vrot.slane %v692_v45, %v2537_v31  ;;  %v707_v57 = vrot.slane %v693_v46, %v2537_v31 }
 0x1bd   : > { %v523_v58 = vcombine.low %v514_v48, %v522_v52  ;;  %v524_v59 = vcombine.high %v514_v48, %v522_v52  ;;  %v557_v60 = vcombine.low %v548_v44, %v556_v53  ;;  %v558_v61 = vcombine.high %v548_v44, %v556_v53 }
 0x1be   : > { %v708_v62 = vcombine.high %v700_v56, %v2288_v41  ;;  %v709_v63 = vcombine.high %v707_v57, %v2288_v41  ;;  %v746_v1 = vpack.i.b16 %v734_v37, %v700_v56  ;;  %v748_v2 = vshrl.u32 %v700_v56, 16 }
 0x1bf   : > { %v762_v3 = vpack.i.b16 %v741_v38, %v707_v57  ;;  %v764_v4 = vshrl.u32 %v707_v57, 16  ;;  %v531_v5 = vrot.slane %v523_v58, %v2537_v31  ;;  %v538_v6 = vrot.slane %v524_v59, %v2537_v31 }
 0x1c0   : > { %v750_v7 = vpack.i.b16 %v749_v50, %v748_v2  ;;  %v754_v8 = vpack.i.b16 %v742_v42, %v708_v62  ;;  %v756_v9 = vshrl.u32 %v708_v62, 16  ;;  %v770_v10 = vpack.i.b16 %v743_v43, %v709_v63 }
 0x1c1   : > { %v766_v11 = vpack.i.b16 %v765_v51, %v764_v4  ;;  %v772_v12 = vshrl.u32 %v709_v63, 16  ;;  %v776_v13 = vcombine.low %v746_v1, %v762_v3  ;;  %v539_v14 = vcombine.high %v531_v5, %v2288_v41 }
 0x1c2   : > { %v758_v15 = vpack.i.b16 %v757_v54, %v756_v9  ;;  %v784_v16 = vcombine.low %v754_v8, %v770_v10  ;;  %v540_v17 = vcombine.high %v538_v6, %v2288_v41  ;;  %v579_v21 = vshrl.u32 %v531_v5, 16 }
 0x1c3   : > { %v774_v18 = vpack.i.b16 %v773_v55, %v772_v12  ;;  %v783_v19 = vrot.slane %v776_v13, %v2534_v27  ;;  %v801_v20 = vcombine.low %v750_v7, %v766_v11  ;;  %v587_v22 = vshrl.u32 %v539_v14, 16 }
 0x1c4   : > { %v595_v23 = vshrl.u32 %v538_v6, 16  ;;  %v565_v24 = vrot.slane %v557_v60, %v2537_v31  ;;  %v572_v25 = vrot.slane %v558_v61, %v2537_v31  ;;  %v603_v28 = vshrl.u32 %v540_v17, 16 }
 0x1c5   : > { %v809_v26 = vcombine.low %v758_v15, %v774_v18  ;;  %v791_v29 = vrot.slane %v784_v16, %v2534_v27  ;;  %v808_v30 = vrot.slane %v801_v20, %v2534_v27 }
 0x1c6   : > { %v573_v32 = vcombine.high %v565_v24, %v2288_v41  ;;  %v574_v33 = vcombine.high %v572_v25, %v2288_v41  ;;  %v577_v34 = vpack.i.b16 %v565_v24, %v531_v5  ;;  %v580_v35 = vshrl.u32 %v565_v24, 16 }
 0x1c7   : > { %v593_v36 = vpack.i.b16 %v572_v25, %v538_v6  ;;  %v596_v37 = vshrl.u32 %v572_v25, 16  ;;  %v792_v38 = vcombine.low %v783_v19, %v791_v29  ;;  %v816_v39 = vrot.slane %v809_v26, %v2534_v27  ;;  %v494_v25 = vpop.f32.mrf.mxu0 }
 0x1c8   : > { %v581_v40 = vpack.i.b16 %v580_v35, %v579_v21  ;;  %v585_v42 = vpack.i.b16 %v573_v32, %v539_v14  ;;  %v588_v43 = vshrl.u32 %v573_v32, 16  ;;  %v601_v44 = vpack.i.b16 %v574_v33, %v540_v17 }
 0x1c9   : > { %v597_v45 = vpack.i.b16 %v596_v37, %v595_v23  ;;  %v604_v46 = vshrl.u32 %v574_v33, 16  ;;  %v607_v47 = vcombine.low %v577_v34, %v593_v36  ;;  %v799_v48 = vrot.slane %v792_v38, %v2537_v31  ;;  %v1871_v26 = vpop.f32.mrf.mxu0 }
 0x1ca   : > { %v589_v49 = vpack.i.b16 %v588_v43, %v587_v22  ;;  %v615_v50 = vcombine.low %v585_v42, %v601_v44  ;;  %v817_v51 = vcombine.low %v808_v30, %v816_v39 }
 0x1cb   : > { %v605_v52 = vpack.i.b16 %v604_v46, %v603_v28  ;;  %v632_v53 = vcombine.low %v581_v40, %v597_v45  ;;  %v614_v54 = vrot.slane %v607_v47, %v2534_v27  ;;  %v829_v58 = vshrl.u32 %v799_v48, 16  ;;  %v497_v28 = vpop.f32.mrf.mxu0 }
 0x1cc   : > { %v622_v55 = vrot.slane %v615_v50, %v2534_v27  ;;  %v824_v56 = vrot.slane %v817_v51, %v2537_v31  ;;  %v800_v4 = vcombine.high %v799_v48, %v2288_v41 }
 0x1cd   : > { %v640_v57 = vcombine.low %v589_v49, %v605_v52  ;;  %v639_v63 = vrot.slane %v632_v53, %v2534_v27  ;;  %v1872_v29 = vpop.f32.mrf.mxu0  ;;  %v838_v52 = vpack.c.bf16 %v494_v25, %v494_v25 }
 0x1ce   : > { %v623_v59 = vcombine.low %v614_v54, %v622_v55  ;;  %v828_v60 = vpack.i.b16 %v824_v56, %v799_v48  ;;  %v830_v61 = vshrl.u32 %v824_v56, 16  ;;  %v825_v62 = vcombine.high %v824_v56, %v2288_v41 }
 0x1cf   : > { %v647_v1 = vrot.slane %v640_v57, %v2534_v27  ;;  %v835_v11 = vshrl.u32 %v800_v4, 16 }
 0x1d0   : > { %v1012_v2 = vsel %vm1007_vm2, %v828_v60, 0  ;;  %v831_v3 = vpack.i.b16 %v830_v61, %v829_v58  ;;  %v630_v7 = vrot.slane %v623_v59, %v2537_v31  ;;  %v836_v8 = vshrl.u32 %v825_v62, 16 }
 0x1d1   : > { %v648_v5 = vcombine.low %v639_v63, %v647_v1  ;;  %1874 = vmatpush3.bf16.xpose.msra.mxu1 %v1012_v2  ;;  %v834_v10 = vpack.i.b16 %v825_v62, %v800_v4 }
 0x1d2   : > { %v1058_v6 = vsel %vm1007_vm2, %v831_v3, 0  ;;  %1885 = vmatprep.subr.bf16.mxu1 %v2281_v0  ;;  %v660_v14 = vshrl.u32 %v630_v7, 16  ;;  %v837_v15 = vpack.i.b16 %v836_v8, %v835_v11  ;;  %v631_v20 = vcombine.high %v630_v7, %v2288_v41 }
 0x1d3   : > { %1880 = vmatpush3.bf16.xpose.msra.mxu0 %v1058_v6  ;;  %v655_v9 = vrot.slane %v648_v5, %v2537_v31  ;;  %v1104_v16 = vsel %vm1007_vm2, %v834_v10, 0 }
 0x1d4   : > { %1891 = vmatprep.subr.bf16.mxu0 %v2281_v0  ;;  %v1150_v19 = vsel %vm1007_vm2, %v837_v15, 0  ;;  %v666_v23 = vshrl.u32 %v631_v20, 16 }
 0x1d5   : > { %v661_v12 = vshrl.u32 %v655_v9, 16  ;;  %v659_v13 = vpack.i.b16 %v655_v9, %v630_v7  ;;  %v656_v18 = vcombine.high %v655_v9, %v2288_v41 }
 0x1d7   : > { %v662_v17 = vpack.i.b16 %v661_v12, %v660_v14  ;;  %v667_v21 = vshrl.u32 %v656_v18, 16  ;;  %v665_v22 = vpack.i.b16 %v656_v18, %v631_v20 }
 0x1d8   : > { %1876 = vmatmul.mubr.msk.bf16.vlgmr.msra.gmra.mxu1 %vm1007_vm2, %v659_v13 }
 0x1d9   : > { %1886 = vmatpush3.bf16.xpose.msra.mxu1 %v1104_v16  ;;  %1887 = vmatprep.mubr.msk.bf16.mxu1 %vm2282_vm0, %v2281_v0  ;;  %v668_v24 = vpack.i.b16 %v667_v21, %v666_v23 }
 0x1da   : > { %1882 = vmatmul.mubr.msk.bf16.vlgmr.msra.gmra.mxu0 %vm1007_vm2, %v662_v17  ;;  %1897 = vmatprep.subr.bf16.mxu1 %v2281_v0 }
 0x1db   : > { %1892 = vmatpush3.bf16.xpose.msra.mxu0 %v1150_v19  ;;  %1893 = vmatprep.mubr.msk.bf16.mxu0 %vm2282_vm0, %v2281_v0  ;;  %v852_v19 = vrot.slane %v838_v52, %v2534_v27 }
 0x1dc   : > { %1903 = vmatprep.subr.bf16.mxu0 %v2281_v0 }
 0x1e0   : > { %1888 = vmatmul.mubr.msk.bf16.vlgmr.msra.gmra.mxu1 %vm1007_vm2, %v665_v22 }
 0x1e1   : > { %1899 = vmatprep.mubr.msk.bf16.mxu1 %vm2282_vm0, %v2281_v0 }
 0x1e2   : > { %1894 = vmatmul.mubr.msk.bf16.vlgmr.msra.gmra.mxu0 %vm1007_vm2, %v668_v24 }
 0x1e3   : > { %1905 = vmatprep.mubr.msk.bf16.mxu0 %vm2282_vm0, %v2281_v0 }
 0x298   : > { %v1048_v30 = vpop.f32.mrf.mxu1 }
 0x299   : > { %v1193_v32 = vsel %vm1192_vm3, %v1048_v30, -inf }
 0x29a   : > { %1194 = vmax.xlane.f32.xlu0 %v1193_v32  ;;  %v1877_v33 = vpop.f32.mrf.mxu1  ;;  %v1094_v34 = vpop.f32.mrf.mxu0 }
 0x29b   : > { %v1196_v35 = vsel %vm1192_vm3, %v1094_v34, -inf }
 0x29c   : > { %v1051_v36 = vpop.f32.mrf.mxu1  ;;  %1197 = vmax.xlane.f32.xlu1 %v1196_v35  ;;  %v1883_v37 = vpop.f32.mrf.mxu0 }
 0x29e   : > { %v1878_v38 = vpop.f32.mrf.mxu1  ;;  %v1097_v39 = vpop.f32.mrf.mxu0 }
 0x2a0   : > { %v1884_v40 = vpop.f32.mrf.mxu0  ;;  %v1140_v42 = vpop.f32.mrf.mxu1 }
 0x2a1   : > { %v1199_v43 = vsel %vm1192_vm3, %v1140_v42, -inf }
 0x2a2   : > { %1200 = vmax.xlane.f32.xlu0 %v1199_v43  ;;  %v1889_v44 = vpop.f32.mrf.mxu1  ;;  %v1186_v45 = vpop.f32.mrf.mxu0 }
 0x2a3   : > { %v1202_v48 = vsel %vm1192_vm3, %v1186_v45, -inf }
 0x2a4   : > { %v1143_v46 = vpop.f32.mrf.mxu1  ;;  %v1895_v47 = vpop.f32.mrf.mxu0 }
 0x2a6   : > { %v1890_v49 = vpop.f32.mrf.mxu1  ;;  %1203 = vmax.xlane.f32.xlu0 %v1202_v48  ;;  %v1189_v50 = vpop.f32.mrf.mxu0 }
 0x2a8   : > { %v1896_v51 = vpop.f32.mrf.mxu0 }
 0x2ad   : > { %840 = vrot.lane.b32.xlu1 %v838_v52, %s2284_s11 }
 0x323   : > { %v1195_v53 = vpop.xlane.xlu0 %1194 }
 0x324   : > { %v1205_v54 = vsub.f32 %v1048_v30, %v1195_v53 }
 0x325   : > { %v1198_v55 = vpop.xlane.xlu1 %1197 }
 0x326   : > { %v1209_v56 = vmul.f32 1.442695, %v1205_v54  ;;  %v1206_v57 = vsub.f32 %v1094_v34, %v1198_v55 }
 0x328   : > { %2052 = vpow2.f32 %v1209_v56  ;;  %v1211_v58 = vmul.f32 1.442695, %v1206_v57 }
 0x329   : > { %v841_v10 = vpop.permute.xlu1 %840 }
 0x32a   : > { %2054 = vpow2.f32 %v1211_v58  ;;  %v886_v14 = vrot.slane %v841_v10, %v2534_v27 }
 0x32b   : > { %v1201_v63 = vpop.xlane.xlu0 %1200 }
 0x32c   : > { %v1207_v2 = vsub.f32 %v1140_v42, %v1201_v63 }
 0x32e   : > { %v1213_v4 = vmul.f32 1.442695, %v1207_v2 }
 0x32f   : > { %v1204_v1 = vpop.xlane.xlu0 %1203 }
 0x330   : > { %v1208_v3 = vsub.f32 %v1186_v45, %v1204_v1  ;;  %2056 = vpow2.f32 %v1213_v4 }
 0x332   : > { %v1215_v5 = vmul.f32 1.442695, %v1208_v3 }
 0x334   : > { %2058 = vpow2.f32 %v1215_v5 }
 0x335   : > { %v2603_v59 = vpop.eup %2052 }
 0x336   : > { %v1217_v60 = vsel %vm1192_vm3, %v2603_v59, 0.0 }
 0x337   : > { %v2607_v61 = vpop.eup %2054  ;;  %1218 = vadd.xlane.f32.xlu1 %v1217_v60 }
 0x338   : > { %v1220_v62 = vsel %vm1192_vm3, %v2607_v61, 0.0 }
 0x339   : > { %1221 = vadd.xlane.f32.xlu0 %v1220_v62 }
 0x33d   : > { %v2613_v6 = vpop.eup %2056 }
 0x33e   : > { %v1223_v8 = vsel %vm1192_vm3, %v2613_v6, 0.0 }
 0x341   : > { %v2615_v7 = vpop.eup %2058 }
 0x342   : > { %v1226_v9 = vsel %vm1192_vm3, %v2615_v7, 0.0 }
 0x348   : > { %844 = vrot.lane.b32.xlu1 %v838_v52, %s2283_s28 }
 0x34f   : > { %842 = vrot.lane.b32.xlu0 %v838_v52, %s2285_s26 }
 0x36c   : > { %1224 = vadd.xlane.f32.xlu1 %v1223_v8 }
 0x36e   : > { %1227 = vadd.xlane.f32.xlu0 %v1226_v9 }
 0x3c0   : > { %v1219_v11 = vpop.xlane.xlu1 %1218 }
 0x3c1   : > { %2060 = vrcp.f32 %v1219_v11 }
 0x3c2   : > { %v1222_v12 = vpop.xlane.xlu0 %1221 }
 0x3c3   : > { %2062 = vrcp.f32 %v1222_v12 }
 0x3c4   : > { %v845_v13 = vpop.permute.xlu1 %844 }
 0x3c5   : > { %v894_v15 = vrot.slane %v845_v13, %v2534_v27 }
 0x3c6   : > { %v843_v16 = vpop.permute.xlu0 %842 }
 0x3c7   : > { %v895_v17 = vcombine.low %v886_v14, %v894_v15  ;;  %v896_v18 = vcombine.high %v886_v14, %v894_v15  ;;  %v860_v20 = vrot.slane %v843_v16, %v2534_v27 }
 0x3c9   : > { %v903_v21 = vrot.slane %v895_v17, %v2537_v31  ;;  %v910_v22 = vrot.slane %v896_v18, %v2537_v31  ;;  %v861_v23 = vcombine.low %v852_v19, %v860_v20  ;;  %v862_v24 = vcombine.high %v852_v19, %v860_v20 }
 0x3cb   : > { %v911_v25 = vcombine.high %v903_v21, %v2288_v41  ;;  %v869_v26 = vrot.slane %v861_v23, %v2537_v31  ;;  %v876_v28 = vrot.slane %v862_v24, %v2537_v31  ;;  %v912_v29 = vcombine.high %v910_v22, %v2288_v41 }
 0x3cc   : > { %v918_v30 = vshrl.u32 %v903_v21, 16  ;;  %v934_v37 = vshrl.u32 %v910_v22, 16 }
 0x3cd   : > { %v877_v32 = vcombine.high %v869_v26, %v2288_v41  ;;  %v878_v33 = vcombine.high %v876_v28, %v2288_v41  ;;  %v915_v34 = vpack.i.b16 %v903_v21, %v869_v26  ;;  %v917_v35 = vshrl.u32 %v869_v26, 16  ;;  %v2048_v26 = vld [vmem:[#allocation10] sm:$0xff]  }
 0x3ce   : > { %v926_v36 = vshrl.u32 %v911_v25, 16  ;;  %v931_v38 = vpack.i.b16 %v910_v22, %v876_v28  ;;  %v933_v39 = vshrl.u32 %v876_v28, 16  ;;  %v942_v45 = vshrl.u32 %v912_v29, 16  ;;  %v2061_v62 = vpop.eup %2060  ;;  %v2049_v28 = vld [vmem:[#allocation10 + $0x8] sm:$0xff]  }
 0x3cf   : > { %v919_v40 = vpack.i.b16 %v918_v30, %v917_v35  ;;  %v923_v42 = vpack.i.b16 %v911_v25, %v877_v32  ;;  %v925_v43 = vshrl.u32 %v877_v32, 16  ;;  %v939_v44 = vpack.i.b16 %v912_v29, %v878_v33 }
 0x3d0   : > { %v935_v46 = vpack.i.b16 %v934_v37, %v933_v39  ;;  %v941_v47 = vshrl.u32 %v878_v33, 16  ;;  %v945_v48 = vcombine.low %v915_v34, %v931_v38  ;;  %v2063_v1 = vpop.eup %2062  ;;  %v1233_v4 = vmul.f32 %v2061_v62, %v2603_v59  ;;  %v2050_v33 = vld [vmem:[#allocation10 + $0x10] sm:$0xff]  }
 0x3d1   : > { %v927_v49 = vpack.i.b16 %v926_v36, %v925_v43  ;;  %v953_v50 = vcombine.low %v923_v42, %v939_v44  ;;  %v1234_v11 = vmul.f32 %v2063_v1, %v2607_v61 }
 0x3d2   : > { %v943_v51 = vpack.i.b16 %v942_v45, %v941_v47  ;;  %v970_v52 = vcombine.low %v919_v40, %v935_v46  ;;  %v952_v53 = vrot.slane %v945_v48, %v2534_v27 }
 0x3d3   : > { %v960_v54 = vrot.slane %v953_v50, %v2534_v27  ;;  %v1238_v17 = vpack.c.bf16 %v1234_v11, %v1234_v11 }
 0x3d4   : > { %v978_v55 = vcombine.low %v927_v49, %v943_v51  ;;  %v977_v57 = vrot.slane %v970_v52, %v2534_v27 }
 0x3d5   : > { %v961_v56 = vcombine.low %v952_v53, %v960_v54 }
 0x3d6   : > { %v985_v58 = vrot.slane %v978_v55, %v2534_v27 }
 0x3d7   : > { %v968_v60 = vrot.slane %v961_v56, %v2537_v31 }
 0x3d8   : > { %v986_v63 = vcombine.low %v977_v57, %v985_v58 }
 0x3d9   : > { %v969_v2 = vcombine.high %v968_v60, %v2288_v41  ;;  %v998_v8 = vshrl.u32 %v968_v60, 16 }
 0x3da   : > { %v993_v3 = vrot.slane %v986_v63, %v2537_v31  ;;  %v1237_v31 = vpack.c.bf16 %v1233_v4, %v1233_v4 }
 0x3db   : > { %v1004_v27 = vshrl.u32 %v969_v2, 16 }
 0x3dc   : > { %v997_v5 = vpack.i.b16 %v993_v3, %v968_v60  ;;  %v999_v9 = vshrl.u32 %v993_v3, 16  ;;  %v994_v10 = vcombine.high %v993_v3, %v2288_v41 }
 0x3de   : > { %v1246_v12 = vsel %vm1244_vm4, %v997_v5, 0  ;;  %v1000_v13 = vpack.i.b16 %v999_v9, %v998_v8  ;;  %v1003_v14 = vpack.i.b16 %v994_v10, %v969_v2  ;;  %v1005_v15 = vshrl.u32 %v994_v10, 16  ;;  %v1811_v2 = vld [vmem:[%s2732_s5] ss:$0 sm:$0xff] }
 0x3df   : > { %1898 = vmatpush3.bf16.msra.mxu1 %v1246_v12 }
 0x3e0   : > { %v1292_v16 = vsel %vm1244_vm4, %v1000_v13, 0  ;;  %1909 = vmatprep.subr.bf16.mxu1 %v2281_v0  ;;  %v1006_v59 = vpack.i.b16 %v1005_v15, %v1004_v27  ;;  %v1338_v41 = vsel %vm1244_vm4, %v1003_v14, 0 }
 0x3e1   : > { %1904 = vmatpush3.bf16.msra.mxu0 %v1292_v16 }
 0x3e2   : > { %1900 = vmatmul.mubr.msk.bf16.vlgmr.msra.gmra.mxu1 %vm1192_vm3, %v1237_v31  ;;  %1915 = vmatprep.subr.bf16.mxu0 %v2281_v0  ;;  %v1384_v61 = vsel %vm1244_vm4, %v1006_v59, 0 }
 0x3e3   : > { %1910 = vmatpush3.bf16.msra.mxu1 %v1338_v41  ;;  %1911 = vmatprep.mubr.msk.bf16.mxu1 %vm2282_vm0, %v2281_v0 }
 0x3e4   : > { %1906 = vmatmul.mubr.msk.bf16.vlgmr.msra.gmra.mxu0 %vm1192_vm3, %v1238_v17  ;;  %1921 = vmatprep.subr.bf16.mxu1 %v2281_v0 }
 0x3e5   : > { %1916 = vmatpush3.bf16.msra.mxu0 %v1384_v61  ;;  %1917 = vmatprep.mubr.msk.bf16.mxu0 %vm2282_vm0, %v2281_v0 }
 0x3e6   : > { %1927 = vmatprep.subr.bf16.mxu0 %v2281_v0 }
 0x3f5   : > { %v1225_v18 = vpop.xlane.xlu1 %1224 }
 0x3f6   : > { %2064 = vrcp.f32 %v1225_v18 }
 0x3f7   : > { %v1228_v19 = vpop.xlane.xlu0 %1227 }
 0x3f8   : > { %2066 = vrcp.f32 %v1228_v19 }
 0x403   : > { %v2065_v20 = vpop.eup %2064 }
 0x404   : > { %v1235_v21 = vmul.f32 %v2065_v20, %v2613_v6 }
 0x405   : > { %v2067_v22 = vpop.eup %2066 }
 0x406   : > { %v1239_v23 = vpack.c.bf16 %v1235_v21, %v1235_v21  ;;  %v1236_v24 = vmul.f32 %v2067_v22, %v2615_v7  ;;  %v2051_v7 = vld [vmem:[#allocation10 + $0x18] sm:$0xff]  }
 0x408   : > { %1912 = vmatmul.mubr.msk.bf16.vlgmr.msra.gmra.mxu1 %vm1192_vm3, %v1239_v23  ;;  %v1240_v25 = vpack.c.bf16 %v1236_v24, %v1236_v24 }
 0x409   : > { %1923 = vmatprep.mubr.msk.bf16.mxu1 %vm2282_vm0, %v2281_v0  ;;  %1922 = vmatpush3.bf16.msra.mxu1 %v2049_v28 }
 0x40a   : > { %1918 = vmatmul.mubr.msk.bf16.vlgmr.msra.gmra.mxu0 %vm1192_vm3, %v1240_v25  ;;  %1933 = vmatprep.subr.bf16.mxu1 %v2281_v0 }
 0x40b   : > { %1929 = vmatprep.mubr.msk.bf16.mxu0 %vm2282_vm0, %v2281_v0  ;;  %1928 = vmatpush3.bf16.msra.mxu0 %v2048_v26 }
 0x40c   : > { %1939 = vmatprep.subr.bf16.mxu0 %v2281_v0 }
 0x4a2   : > { %v1282_v6 = vpop.f32.mrf.mxu1 }
 0x4a3   : > { %v1426_v29 = vpack.c.bf16 %v1282_v6, %v1282_v6 }
 0x4a4   : > { %v1901_v30 = vpop.f32.mrf.mxu1  ;;  %v1328_v32 = vpop.f32.mrf.mxu0 }
 0x4a5   : > { %v1427_v34 = vpack.c.bf16 %v1328_v32, %v1328_v32  ;;  %1930 = vmatmul.mubr.msk.bf16.vlgmr.msra.gmra.mxu0 %vm1007_vm2, %v1426_v29 }
 0x4a6   : > { %v1285_v35 = vpop.f32.mrf.mxu1  ;;  %v1907_v36 = vpop.f32.mrf.mxu0  ;;  %1940 = vmatpush3.bf16.msra.mxu0 %v2051_v7  ;;  %1941 = vmatprep.mubr.msk.bf16.mxu0 %vm2282_vm0, %v2281_v0 }
 0x4a7   : > { %1924 = vmatmul.mubr.msk.bf16.vlgmr.msra.gmra.mxu1 %vm1007_vm2, %v1427_v34 }
 0x4a8   : > { %v1902_v37 = vpop.f32.mrf.mxu1  ;;  %v1331_v38 = vpop.f32.mrf.mxu0  ;;  %1934 = vmatpush3.bf16.msra.mxu1 %v2050_v33  ;;  %1935 = vmatprep.mubr.msk.bf16.mxu1 %vm2282_vm0, %v2281_v0 }
 0x4aa   : > { %v1908_v39 = vpop.f32.mrf.mxu0 }
 0x4c8   : > { %v1374_v40 = vpop.f32.mrf.mxu1 }
 0x4c9   : > { %v1428_v42 = vpack.c.bf16 %v1374_v40, %v1374_v40 }
 0x4ca   : > { %v1913_v43 = vpop.f32.mrf.mxu1  ;;  %v1420_v44 = vpop.f32.mrf.mxu0 }
 0x4cb   : > { %v1429_v45 = vpack.c.bf16 %v1420_v44, %v1420_v44  ;;  %1936 = vmatmul.mubr.msk.bf16.vlgmr.msra.gmra.mxu1 %vm1007_vm2, %v1428_v42 }
 0x4cc   : > { %v1377_v46 = vpop.f32.mrf.mxu1  ;;  %v1919_v47 = vpop.f32.mrf.mxu0 }
 0x4cd   : > { %1942 = vmatmul.mubr.msk.bf16.vlgmr.msra.gmra.mxu0 %vm1007_vm2, %v1429_v45 }
 0x4ce   : > { %v1914_v48 = vpop.f32.mrf.mxu1  ;;  %v1423_v49 = vpop.f32.mrf.mxu0 }
 0x4d0   : > { %v1920_v50 = vpop.f32.mrf.mxu0 }
 0x565   : > { %v1527_v51 = vpop.f32.mrf.mxu0 }
 0x567   : > { %v1478_v52 = vpop.f32.mrf.mxu1  ;;  %v1931_v0 = vpop.f32.mrf.mxu0 }
 0x568   : > { %v1528_v58 = vadd.f32 %v1527_v51, %v1478_v52 }
 0x569   : > { %v1925_v53 = vpop.f32.mrf.mxu1  ;;  %v1530_v54 = vpop.f32.mrf.mxu0 }
 0x56b   : > { %v1481_v55 = vpop.f32.mrf.mxu1  ;;  %v1932_v56 = vpop.f32.mrf.mxu0 }
 0x56d   : > { %v1926_v57 = vpop.f32.mrf.mxu1 }
 0x58b   : > { %v1579_v60 = vpop.f32.mrf.mxu1 }
 0x58c   : > { %v1585_v62 = vadd.f32 %v1579_v60, %v1528_v58 }
 0x58d   : > { %v1937_v63 = vpop.f32.mrf.mxu1  ;;  %v1632_v1 = vpop.f32.mrf.mxu0 }
 0x58e   : > { %v1638_v3 = vadd.f32 %v1632_v1, %v1585_v62 }
 0x58f   : > { %v1582_v4 = vpop.f32.mrf.mxu1  ;;  %v1943_v5 = vpop.f32.mrf.mxu0 }
 0x590   : > { %v1646_v8 = vadd.f32 %v1811_v2, %v1638_v3 }
 0x591   : > { %v1938_v9 = vpop.f32.mrf.mxu1  ;;  %v1635_v10 = vpop.f32.mrf.mxu0 }
 0x592   : > { %1647 = vst [vmem:[%s324_s20] sm:$0xff] %v1646_v8 }
 0x593   : > { %v1944_v11 = vpop.f32.mrf.mxu0 }
 0x594   : > { %2213 = shalt.err (!%p2210_p11)
}
 0x595   : > { %s2214_s28 = scalar_lea.hbm %s2684_s12, 128  ;;  %s2218_s26 = scalar_lea.hbm %s2733_s6, 256 }
 0x596   : > { %p2215_p13 = scmp.ne.s32.totalorder %s2684_s12, %s2214_s28  ;;  %p2219_p4 = scmp.lt.s32.totalorder %s2684_s12, %s2733_s6 }
 0x597   : > { %p2220_p6 = scmp.lt.s32.totalorder %s2218_s26, %s2214_s28 }
 0x598   : > { %p2216_p1 = pnand %p2215_p13, %p2753_p7 }
 0x599   : > { %p2221_p5 = por %p2220_p6, %p2219_p4 }
 0x59a   : > { %p2217_p3 = pneg %p2216_p1 }
 0x59c   : > { %p2222_p8 = pnand %p2221_p5, %p2217_p3 }
 0x59e   : > { %2225 = shalt.err (!%p2222_p8)
}
 0x59f   : > { %1963 = dma.vmem_to_hbm [thread:$0]  (%p2753_p7), %s2686_s18, 128, %s2684_s12, %s1649_s27  }
 0x5a0 PF: > { %s1674_s7 = sand.u32 1, %s2260_s21   ;;  %p2754_p10 = scmp.ne.s32.totalorder %s2745_s17, 0 }
 0x5a1   : > { %p2755_p0 = scmp.ge.s32.totalorder %s2272_s24, 2  ;;  %s1675_s20 = scalar_lea.sflag [#allocation4], %s1674_s7 }
 0x5a3   : > { %p1983_p12 = pnand %p2755_p0, %p2754_p10 }
 0x5a5   : > { %p1984_p2 = pneg %p1983_p12 }
 0x5a7   : > { %2255 = dma.done.wait (%p1984_p2), %s1675_s20, 128  }
 0x5a8   : > { %2257 = vsyncadd (%p1984_p2), %s1675_s20, 4294967168  ;;  %p21_p9 = scmp.ge.s32.totalorder %s2426_s9, 4   ;;  %s2756_s21 = smov %s2264_s22 }
 0x5a9   : > { %s2757_s22 = smov %s2268_s23  ;;  %s2758_s23 = smov %s2437_s14 }
 0x5aa   : > { %s2759_s24 = smov %s2426_s9  ;;  %23 = sbr.rel (!%p21_p9) target bundleno = 9 (0x9), region = 108 }
 0x5af   :  { %1680 = vsyncpa [#allocation3], 1 }
 0x5b0   :  { %1682 = vsyncpa [#allocation3 + $0x1], 1 }
 0x5b1   :  { %1683 = vsyncpa [#allocation6], 1 }
 0x5b2   :  { %1684 = vsyncpa [#allocation9], 1 }
 0x5b3   :  { %1685 = vsyncpa [#allocation4], 1 }
 0x5b4   :  { %1687 = vsyncpa [#allocation4 + $0x1], 1 }

</bundles_post_ra>
